<compile_context>
chip_gen: v6e
topology: v6e:2x2x1
jax: 0.10.0
libtpu: 0.0.40
codegen_flags: <defaults>
</compile_context>

<pallas_src>
import jax
import jax.numpy as jnp
from jax.experimental import pallas as pl
from jax.experimental.pallas import tpu as pltpu

D_IN, H1, H2, D_OUT = 5, 128, 64, 1


def _mlp_kernel(xt_ref, w1_ref, b1_ref, w2_ref, b2_ref, w3_ref, b3_ref, o_ref):
    xt = xt_ref[...]                                   # (D_IN, TB)
    w1 = w1_ref[...]                                   # (H1, D_IN)

    # fc1 + ReLU on the VPU: 5 rank-1 broadcast FMAs accumulated in f32,
    # bias folded into the first term.
    h = b1_ref[...] + w1[:, 0:1] * xt[0:1, :]          # (H1, TB)
    for k in range(1, D_IN):
        h = h + w1[:, k:k + 1] * xt[k:k + 1, :]
    h = jnp.maximum(h, 0.0)

    # fc2 + ReLU: the only real MXU matmul (M=64, K=128, N=TB), f32 accumulate.
    h = jnp.dot(w2_ref[...], h, preferred_element_type=jnp.float32)  # (H2, TB)
    h = jnp.maximum(h + b2_ref[...], 0.0)

    # fc3: N=1 -> VPU multiply + sublane (XLU) reduction instead of a 1-lane
    # MXU pass; the result is already lane-dense (1, TB).
    o = jnp.sum(w3_ref[...] * h, axis=0, keepdims=True) + b3_ref[...]
    o_ref[...] = o


def stock_market_net(x, params, *, tb=2048):
    """Fused forward pass of StockMarketNet.  x: (B, 5) f32 -> (B, 1) f32."""
    assert tb % 128 == 0, "batch tile must be a multiple of the 128-lane width"
    B = x.shape[0]
    x = x.astype(jnp.float32)

    # Batch tile (multiple of 128).  Small batches collapse to a single tile;
    # ragged batches are zero-padded to a multiple of TB (tail rows discarded).
    TB = int(tb) if B >= int(tb) else ((B + 127) // 128) * 128
    B_pad = pl.cdiv(B, TB) * TB

    # Wrapper-side layout plumbing: batch on the lane axis, padded to tiles.
    xt = x.T                                           # (D_IN, B)
    if B_pad != B:
        xt = jnp.pad(xt, ((0, 0), (0, B_pad - B)))

    grid = (B_pad // TB,)
    const = lambda shape: pl.BlockSpec(shape, lambda i: (0, 0))  # VMEM-resident

    flops = 2 * B_pad * (D_IN * H1 + H1 * H2 + H2)
    weight_bytes = 4 * (H1 * D_IN + H1 + H2 * H1 + H2 + H2 + 1)
    bytes_accessed = 4 * B_pad * (D_IN + D_OUT) + weight_bytes

    out = pl.pallas_call(
        _mlp_kernel,
        out_shape=jax.ShapeDtypeStruct((1, B_pad), jnp.float32),
        grid=grid,
        in_specs=[
            pl.BlockSpec((D_IN, TB), lambda i: (0, i)),   # x^T tile (pipelined)
            const((H1, D_IN)),                            # w1   (128, 5)
            const((H1, 1)),                               # b1   (128, 1)
            const((H2, H1)),                              # w2   (64, 128)
            const((H2, 1)),                               # b2   (64, 1)
            const((H2, 1)),                               # w3^T (64, 1)
            const((1, 1)),                                # b3   (1, 1)
        ],
        out_specs=pl.BlockSpec((1, TB), lambda i: (0, i)),  # lane-dense output
        compiler_params=pltpu.CompilerParams(
            dimension_semantics=("parallel",)),
        cost_estimate=pl.CostEstimate(
            flops=flops, transcendentals=0, bytes_accessed=bytes_accessed),
    )(xt, params["w1"], params["b1"], params["w2"], params["b2"],
      params["w3"], params["b3"])

    return out[0, :B].reshape(B, D_OUT)


def init_params(key):
    """PyTorch nn.Linear-style init: U(-1/sqrt(fan_in), +1/sqrt(fan_in)).

    Weights stay in PyTorch (out, in) layout; fc3's weight is stored
    transposed as (64, 1) so the kernel reduces it directly against the
    (64, TB) activations.  Biases are stored as column vectors (out, 1).
    """
    ks = jax.random.split(key, 6)

    def linear(kw, kb, fan_in, fan_out):
        bound = 1.0 / jnp.sqrt(jnp.float32(fan_in))
        w = jax.random.uniform(kw, (fan_out, fan_in), jnp.float32, -bound, bound)
        b = jax.random.uniform(kb, (fan_out, 1), jnp.float32, -bound, bound)
        return w, b

    w1, b1 = linear(ks[0], ks[1], D_IN, H1)     # (128, 5), (128, 1)
    w2, b2 = linear(ks[2], ks[3], H1, H2)       # (64, 128), (64, 1)
    w3, b3 = linear(ks[4], ks[5], H2, D_OUT)    # (1, 64),  (1, 1)
    return dict(w1=w1, b1=b1, w2=w2, b2=b2, w3=w3.T, b3=b3)


if __name__ == "__main__":
    key = jax.random.PRNGKey(0)
    kp, kx = jax.random.split(key)
    params = init_params(kp)

    def reference(xin):
        r = jnp.maximum(xin @ params["w1"].T + params["b1"].T, 0.0)
        r = jnp.maximum(r @ params["w2"].T + params["b2"].T, 0.0)
        return r @ params["w3"] + params["b3"]

    # Small demo batch (single 128-row tile after padding).
    B = 8
    x = jax.random.normal(kx, (B, D_IN), jnp.float32)
    out = jax.block_until_ready(stock_market_net(x, params))
    assert out.shape == (B, D_OUT)
    assert jnp.allclose(out, reference(x), atol=1e-4, rtol=1e-4)

    # Ragged batch exercising the multi-tile / padded-tail path (grid > 1).
    B2 = 200
    x2 = jax.random.normal(jax.random.PRNGKey(1), (B2, D_IN), jnp.float32)
    out2 = jax.block_until_ready(stock_market_net(x2, params, tb=128))
    assert out2.shape == (B2, D_OUT)
    assert jnp.allclose(out2, reference(x2), atol=1e-4, rtol=1e-4)

    print("KERNEL_OK")
</pallas_src>

<mosaic_0001>
module attributes {stable_mosaic.version = 11 : i64} {
  func.func @_mlp_kernel(%arg0: i32, %arg1: memref<5x128xf32, #tpu.memory_space<vmem>>, %arg2: memref<128x5xf32, #tpu.memory_space<vmem>>, %arg3: memref<128x1xf32, #tpu.memory_space<vmem>>, %arg4: memref<64x128xf32, #tpu.memory_space<vmem>>, %arg5: memref<64x1xf32, #tpu.memory_space<vmem>>, %arg6: memref<64x1xf32, #tpu.memory_space<vmem>>, %arg7: memref<1x1xf32, #tpu.memory_space<vmem>>, %arg8: memref<1x128xf32, #tpu.memory_space<vmem>>) attributes {dimension_semantics = [#tpu.dimension_semantics<parallel>], iteration_bounds = array<i64: 1>, scalar_prefetch = 0 : i64, scratch_operands = 0 : i64, tpu.core_type = #tpu.core_type<tc>, window_params = [{transform_indices = @transform_0, window_bounds = array<i64: 5, 128>}, {pipeline_mode = #tpu.pipeline_mode<synchronous>, transform_indices = @transform_1, window_bounds = array<i64: 128, 5>}, {pipeline_mode = #tpu.pipeline_mode<synchronous>, transform_indices = @transform_2, window_bounds = array<i64: 128, 1>}, {pipeline_mode = #tpu.pipeline_mode<synchronous>, transform_indices = @transform_3, window_bounds = array<i64: 64, 128>}, {pipeline_mode = #tpu.pipeline_mode<synchronous>, transform_indices = @transform_4, window_bounds = array<i64: 64, 1>}, {pipeline_mode = #tpu.pipeline_mode<synchronous>, transform_indices = @transform_5, window_bounds = array<i64: 64, 1>}, {pipeline_mode = #tpu.pipeline_mode<synchronous>, transform_indices = @transform_6, window_bounds = array<i64: 1, 1>}, {transform_indices = @transform_7, window_bounds = array<i64: 1, 128>}]} {
    %c0 = arith.constant 0 : index
    %c0_0 = arith.constant 0 : index
    %0 = vector.load %arg1[%c0, %c0_0] : memref<5x128xf32, #tpu.memory_space<vmem>>, vector<5x128xf32>
    %c0_1 = arith.constant 0 : index
    %c0_2 = arith.constant 0 : index
    %1 = vector.load %arg2[%c0_1, %c0_2] : memref<128x5xf32, #tpu.memory_space<vmem>>, vector<128x5xf32>
    %c0_3 = arith.constant 0 : index
    %c0_4 = arith.constant 0 : index
    %2 = vector.load %arg3[%c0_3, %c0_4] : memref<128x1xf32, #tpu.memory_space<vmem>>, vector<128x1xf32>
    %3 = vector.extract_strided_slice %1 {offsets = [0, 0], sizes = [128, 1], strides = [1, 1]} : vector<128x5xf32> to vector<128x1xf32>
    %4 = vector.extract_strided_slice %0 {offsets = [0, 0], sizes = [1, 128], strides = [1, 1]} : vector<5x128xf32> to vector<1x128xf32>
    %5 = vector.broadcast %3 : vector<128x1xf32> to vector<128x128xf32>
    %6 = vector.broadcast %4 : vector<1x128xf32> to vector<128x128xf32>
    %7 = arith.mulf %5, %6 : vector<128x128xf32>
    %8 = vector.broadcast %2 : vector<128x1xf32> to vector<128x128xf32>
    %9 = arith.addf %8, %7 : vector<128x128xf32>
    %10 = vector.extract_strided_slice %1 {offsets = [0, 1], sizes = [128, 1], strides = [1, 1]} : vector<128x5xf32> to vector<128x1xf32>
    %11 = vector.extract_strided_slice %0 {offsets = [1, 0], sizes = [1, 128], strides = [1, 1]} : vector<5x128xf32> to vector<1x128xf32>
    %12 = vector.broadcast %10 : vector<128x1xf32> to vector<128x128xf32>
    %13 = vector.broadcast %11 : vector<1x128xf32> to vector<128x128xf32>
    %14 = arith.mulf %12, %13 : vector<128x128xf32>
    %15 = arith.addf %9, %14 : vector<128x128xf32>
    %16 = vector.extract_strided_slice %1 {offsets = [0, 2], sizes = [128, 1], strides = [1, 1]} : vector<128x5xf32> to vector<128x1xf32>
    %17 = vector.extract_strided_slice %0 {offsets = [2, 0], sizes = [1, 128], strides = [1, 1]} : vector<5x128xf32> to vector<1x128xf32>
    %18 = vector.broadcast %16 : vector<128x1xf32> to vector<128x128xf32>
    %19 = vector.broadcast %17 : vector<1x128xf32> to vector<128x128xf32>
    %20 = arith.mulf %18, %19 : vector<128x128xf32>
    %21 = arith.addf %15, %20 : vector<128x128xf32>
    %22 = vector.extract_strided_slice %1 {offsets = [0, 3], sizes = [128, 1], strides = [1, 1]} : vector<128x5xf32> to vector<128x1xf32>
    %23 = vector.extract_strided_slice %0 {offsets = [3, 0], sizes = [1, 128], strides = [1, 1]} : vector<5x128xf32> to vector<1x128xf32>
    %24 = vector.broadcast %22 : vector<128x1xf32> to vector<128x128xf32>
    %25 = vector.broadcast %23 : vector<1x128xf32> to vector<128x128xf32>
    %26 = arith.mulf %24, %25 : vector<128x128xf32>
    %27 = arith.addf %21, %26 : vector<128x128xf32>
    %28 = vector.extract_strided_slice %1 {offsets = [0, 4], sizes = [128, 1], strides = [1, 1]} : vector<128x5xf32> to vector<128x1xf32>
    %29 = vector.extract_strided_slice %0 {offsets = [4, 0], sizes = [1, 128], strides = [1, 1]} : vector<5x128xf32> to vector<1x128xf32>
    %30 = vector.broadcast %28 : vector<128x1xf32> to vector<128x128xf32>
    %31 = vector.broadcast %29 : vector<1x128xf32> to vector<128x128xf32>
    %32 = arith.mulf %30, %31 : vector<128x128xf32>
    %33 = arith.addf %27, %32 : vector<128x128xf32>
    %cst = arith.constant 0.000000e+00 : f32
    %34 = vector.broadcast %cst : f32 to vector<128x128xf32>
    %35 = arith.maximumf %33, %34 : vector<128x128xf32>
    %c0_5 = arith.constant 0 : index
    %c0_6 = arith.constant 0 : index
    %36 = vector.load %arg4[%c0_5, %c0_6] : memref<64x128xf32, #tpu.memory_space<vmem>>, vector<64x128xf32>
    %cst_7 = arith.constant dense<0.000000e+00> : vector<64x128xf32>
    %37 = tpu.matmul %36, %35, %cst_7 {dimension_numbers = #tpu.dot_dimension_numbers<[1], [0], [0], [1], [0, 0, 1, 1], [], []>} : vector<64x128xf32>, vector<128x128xf32>, vector<64x128xf32> -> vector<64x128xf32>
    %c0_8 = arith.constant 0 : index
    %c0_9 = arith.constant 0 : index
    %38 = vector.load %arg5[%c0_8, %c0_9] : memref<64x1xf32, #tpu.memory_space<vmem>>, vector<64x1xf32>
    %39 = vector.broadcast %38 : vector<64x1xf32> to vector<64x128xf32>
    %40 = arith.addf %37, %39 : vector<64x128xf32>
    %cst_10 = arith.constant 0.000000e+00 : f32
    %41 = vector.broadcast %cst_10 : f32 to vector<64x128xf32>
    %42 = arith.maximumf %40, %41 : vector<64x128xf32>
    %c0_11 = arith.constant 0 : index
    %c0_12 = arith.constant 0 : index
    %43 = vector.load %arg6[%c0_11, %c0_12] : memref<64x1xf32, #tpu.memory_space<vmem>>, vector<64x1xf32>
    %44 = vector.broadcast %43 : vector<64x1xf32> to vector<64x128xf32>
    %45 = arith.mulf %44, %42 : vector<64x128xf32>
    %cst_13 = arith.constant dense<0.000000e+00> : vector<128xf32>
    %46 = vector.multi_reduction <add>, %45, %cst_13 [0] : vector<64x128xf32> to vector<128xf32>
    %47 = vector.shape_cast %46 : vector<128xf32> to vector<1x128xf32>
    %c0_14 = arith.constant 0 : index
    %c0_15 = arith.constant 0 : index
    %48 = vector.load %arg7[%c0_14, %c0_15] : memref<1x1xf32, #tpu.memory_space<vmem>>, vector<1x1xf32>
    %49 = vector.broadcast %48 : vector<1x1xf32> to vector<1x128xf32>
    %50 = arith.addf %47, %49 : vector<1x128xf32>
    %c0_16 = arith.constant 0 : index
    %c0_17 = arith.constant 0 : index
    %51 = vector.load %arg8[%c0_16, %c0_17] : memref<1x128xf32, #tpu.memory_space<vmem>>, vector<1x128xf32>
    tpu.vector_store %arg8[%c0_16, %c0_17], %50 {strides = array<i32>} : memref<1x128xf32, #tpu.memory_space<vmem>>, vector<1x128xf32>,
    return
  }
  func.func @transform_0(%arg0: i32) -> (i32, i32) {
    %c0_i32 = arith.constant 0 : i32
    %c0_i32_0 = arith.constant 0 : i32
    return %c0_i32, %arg0 : i32, i32
  }
  func.func @transform_1(%arg0: i32) -> (i32, i32) {
    %c0_i32 = arith.constant 0 : i32
    %c0_i32_0 = arith.constant 0 : i32
    %c0_i32_1 = arith.constant 0 : i32
    return %c0_i32, %c0_i32_0 : i32, i32
  }
  func.func @transform_2(%arg0: i32) -> (i32, i32) {
    %c0_i32 = arith.constant 0 : i32
    %c0_i32_0 = arith.constant 0 : i32
    %c0_i32_1 = arith.constant 0 : i32
    return %c0_i32, %c0_i32_0 : i32, i32
  }
  func.func @transform_3(%arg0: i32) -> (i32, i32) {
    %c0_i32 = arith.constant 0 : i32
    %c0_i32_0 = arith.constant 0 : i32
    %c0_i32_1 = arith.constant 0 : i32
    return %c0_i32, %c0_i32_0 : i32, i32
  }
  func.func @transform_4(%arg0: i32) -> (i32, i32) {
    %c0_i32 = arith.constant 0 : i32
    %c0_i32_0 = arith.constant 0 : i32
    %c0_i32_1 = arith.constant 0 : i32
    return %c0_i32, %c0_i32_0 : i32, i32
  }
  func.func @transform_5(%arg0: i32) -> (i32, i32) {
    %c0_i32 = arith.constant 0 : i32
    %c0_i32_0 = arith.constant 0 : i32
    %c0_i32_1 = arith.constant 0 : i32
    return %c0_i32, %c0_i32_0 : i32, i32
  }
  func.func @transform_6(%arg0: i32) -> (i32, i32) {
    %c0_i32 = arith.constant 0 : i32
    %c0_i32_0 = arith.constant 0 : i32
    %c0_i32_1 = arith.constant 0 : i32
    return %c0_i32, %c0_i32_0 : i32, i32
  }
  func.func @transform_7(%arg0: i32) -> (i32, i32) {
    %c0_i32 = arith.constant 0 : i32
    %c0_i32_0 = arith.constant 0 : i32
    return %c0_i32, %arg0 : i32, i32
  }
}

</mosaic_0001>

<bundles_post_ra>
// kernel: tpu_custom_call.1
= control target key start
LH: loop header
LB: loop body
LE: loop exit
PB: predicated region body
PF: predicated region fallthrough
CT: control target
= control target key end

     0   :  { %s1732_s0 = inlined_call_operand.vmem [shape: f32[5,128], index: 0, kind: input, shape index: {}]   ;;  %s1733_s1 = inlined_call_operand.vmem [shape: f32[128,5], index: 1, kind: input, shape index: {}]   ;;  %s1734_s2 = inlined_call_operand.vmem [shape: f32[128,1], index: 2, kind: input, shape index: {}]   ;;  %s1735_s3 = inlined_call_operand.vmem [shape: f32[64,128], index: 3, kind: input, shape index: {}]   ;;  %s1736_s4 = inlined_call_operand.vmem [shape: f32[64,1], index: 4, kind: input, shape index: {}]   ;;  %s1737_s5 = inlined_call_operand.vmem [shape: f32[64,1], index: 5, kind: input, shape index: {}]   ;;  %s1738_s6 = inlined_call_operand.<no memory space> [shape: f32[1,1], index: 6, kind: input, shape index: {}]   ;;  %s1739_s7 = inlined_call_operand.hbm [shape: f32[1,128], index: 7, kind: output, shape index: {}]  }
   0x1   :  { %v12_v0 = vstv %s1738_s6 }
   0x2   :  { %13 = vst [vmem:[#allocation2] sm:$0x1] %v12_v0 }
   0x3   :  { %v1168_v1 = vld [vmem:[%s1733_s1 + $0x10] sm:$0xff]  ;;  %v1173_v2 = vld [vmem:[%s1733_s1] sm:$0xff]  ;;  %v1741_v3 = vmov 0   ;;  %v1182_v4 = vld [vmem:[%s1733_s1 + $0x18] sm:$0xff] }
   0x4   :  { %1045 = vset.pattern.permute.xlu1 %v1741_v3  ;;  %1044 = vset.pattern.permute.xlu0 %v1741_v3  ;;  %v1187_v5 = vld [vmem:[%s1733_s1 + $0x8] sm:$0xff]  ;;  %v1199_v7 = vld [vmem:[%s1733_s1 + $0x20] sm:$0xff]  ;;  %v1206_v8 = vld [vmem:[%s1733_s1 + $0x38] sm:$0xff] }
   0x5   :  { %74 = vperm.xlu1 %1045, %v1168_v1   ;;  %64 = vperm.xlu0 %1044, %v1173_v2   ;;  %v1194_v6 = vld [vmem:[%s1733_s1 + $0x28] sm:$0xff]  ;;  %v1211_v9 = vld [vmem:[%s1733_s1 + $0x30] sm:$0xff] }
   0x9   :  { %79 = vperm.xlu1 %1045, %v1182_v4   ;;  %69 = vperm.xlu0 %1044, %v1187_v5  }
   0xd   :  { %89 = vperm.xlu1 %1045, %v1194_v6   ;;  %84 = vperm.xlu0 %1044, %v1199_v7  }
   0xe   :  { %14 = vsyncpa [#allocation4], 0  ;;  %v1218_v10 = vld [vmem:[%s1733_s1 + $0x48] sm:$0xff]  ;;  %v1223_v11 = vld [vmem:[%s1733_s1 + $0x40] sm:$0xff]  ;;  %v1744_v33 = vmov 4   ;;  %v1118_v34 = vmov 1   ;;  %v142_v38 = vlaneseq }
   0xf   :  { %v1230_v12 = vld [vmem:[%s1733_s1 + $0x58] sm:$0xff]  ;;  %v1235_v13 = vld [vmem:[%s1733_s1 + $0x50] sm:$0xff]  ;;  %v1242_v14 = vld [vmem:[%s1733_s1 + $0x68] sm:$0xff]  ;;  %v1746_v36 = vmov 3   ;;  %v1742_v37 = vmov 2  }
  0x10   :  { %v1247_v15 = vld [vmem:[%s1733_s1 + $0x60] sm:$0xff]  ;;  %v1254_v16 = vld [vmem:[%s1733_s1 + $0x78] sm:$0xff]  ;;  %v1259_v17 = vld [vmem:[%s1733_s1 + $0x70] sm:$0xff]  ;;  %v1348_v39 = vshrl.u32 %v142_v38, 7 }
  0x11   :  { %99 = vperm.xlu1 %1045, %v1206_v8   ;;  %94 = vperm.xlu0 %1044, %v1211_v9   ;;  %v47_v18 = vld [vmem:[%s1734_s2 + $0x8] sm:$0xff]  ;;  %v46_v19 = vld [vmem:[%s1734_s2] sm:$0xff]  ;;  %v49_v20 = vld [vmem:[%s1734_s2 + $0x18] sm:$0xff] }
  0x12   :  { %v48_v21 = vld [vmem:[%s1734_s2 + $0x10] sm:$0xff]  ;;  %v51_v22 = vld [vmem:[%s1734_s2 + $0x28] sm:$0xff]  ;;  %v50_v23 = vld [vmem:[%s1734_s2 + $0x20] sm:$0xff]  ;;  %1749 = vst [vmem:[#allocation6_spill] sm:$0xff] %v1348_v39  ;;  %v1740_v40 = vsub.s32 0, %v1348_v39 }
  0x13   :  { %v53_v24 = vld [vmem:[%s1734_s2 + $0x38] sm:$0xff]  ;;  %v52_v25 = vld [vmem:[%s1734_s2 + $0x30] sm:$0xff]  ;;  %v55_v26 = vld [vmem:[%s1734_s2 + $0x48] sm:$0xff] }
  0x14   :  { %v54_v27 = vld [vmem:[%s1734_s2 + $0x40] sm:$0xff]  ;;  %v57_v28 = vld [vmem:[%s1734_s2 + $0x58] sm:$0xff]  ;;  %v56_v29 = vld [vmem:[%s1734_s2 + $0x50] sm:$0xff] }
  0x15   :  { %109 = vperm.xlu1 %1045, %v1218_v10   ;;  %104 = vperm.xlu0 %1044, %v1223_v11   ;;  %v61_v30 = vld [vmem:[%s1734_s2 + $0x78] sm:$0xff]  ;;  %v58_v31 = vld [vmem:[%s1734_s2 + $0x60] sm:$0xff]  ;;  %v60_v32 = vld [vmem:[%s1734_s2 + $0x70] sm:$0xff] }
  0x16   :  { %v59_v35 = vld [vmem:[%s1734_s2 + $0x68] sm:$0xff]  ;;  %v1357_v41 = vld [vmem:[%s1732_s0] sm:$0x1f] }
  0x17   :  { %v1364_v42 = vrot.slane %v1357_v41, %v1740_v40 }
  0x19   :  { %119 = vperm.xlu1 %1045, %v1230_v12   ;;  %114 = vperm.xlu0 %1044, %v1235_v13  }
  0x1d   :  { %129 = vperm.xlu1 %1045, %v1242_v14   ;;  %124 = vperm.xlu0 %1044, %v1247_v15  }
  0x21   :  { %139 = vperm.xlu1 %1045, %v1254_v16   ;;  %134 = vperm.xlu0 %1044, %v1259_v17  }
  0x25   :  { %169 = vperm.xlu1 %1045, %v47_v18   ;;  %164 = vperm.xlu0 %1044, %v46_v19  }
  0x29   :  { %179 = vperm.xlu1 %1045, %v49_v20   ;;  %174 = vperm.xlu0 %1044, %v48_v21  }
  0x2d   :  { %189 = vperm.xlu1 %1045, %v51_v22   ;;  %184 = vperm.xlu0 %1044, %v50_v23  }
  0x31   :  { %199 = vperm.xlu1 %1045, %v53_v24   ;;  %194 = vperm.xlu0 %1044, %v52_v25  }
  0x35   :  { %209 = vperm.xlu1 %1045, %v55_v26   ;;  %204 = vperm.xlu0 %1044, %v54_v27  }
  0x39   :  { %219 = vperm.xlu1 %1045, %v57_v28   ;;  %214 = vperm.xlu0 %1044, %v56_v29  }
  0x3d   :  { %239 = vperm.xlu1 %1045, %v61_v30   ;;  %224 = vperm.xlu0 %1044, %v58_v31  }
  0x41   :  { %234 = vperm.xlu1 %1045, %v60_v32   ;;  %1052 = vset.pattern.permute.xlu0 %v1744_v33 }
  0x42   :  { %619 = vperm.xlu0 %1052, %v1254_v16  }
  0x45   :  { %1046 = vset.pattern.permute.xlu1 %v1118_v34 }
  0x46   :  { %315 = vperm.xlu1 %1046, %v1259_v17   ;;  %607 = vperm.xlu0 %1052, %v1247_v15  }
  0x4a   :  { %1047 = vset.pattern.permute.xlu1 %v1741_v3  ;;  %1061 = vset.pattern.permute.xlu0 %v1746_v36 }
  0x4b   :  { %229 = vperm.xlu1 %1047, %v59_v35   ;;  %511 = vperm.xlu0 %1061, %v1242_v14  }
  0x4f   :  { %1048 = vset.pattern.permute.xlu1 %v1118_v34  ;;  %499 = vperm.xlu0 %1061, %v1235_v13  }
  0x50   :  { %311 = vperm.xlu1 %1048, %v1242_v14  }
  0x53   :  { %487 = vperm.xlu0 %1061, %v1206_v8  }
  0x54   :  { %1049 = vset.pattern.permute.xlu1 %v1746_v36 }
  0x55   :  { %519 = vperm.xlu1 %1049, %v1254_v16  }
  0x57   :  { %475 = vperm.xlu0 %1061, %v1199_v7  }
  0x59   :  { %1050 = vset.pattern.permute.xlu1 %v1742_v37 }
  0x5a   :  { %411 = vperm.xlu1 %1050, %v1242_v14  }
  0x5b   :  { %1080 = vset.pattern.permute.xlu0 %v1742_v37 }
  0x5c   :  { %419 = vperm.xlu0 %1080, %v1254_v16  }
  0x5e   :  { %1051 = vset.pattern.permute.xlu1 %v1746_v36 }
  0x5f   :  { %515 = vperm.xlu1 %1051, %v1259_v17  }
  0x60   :  { %415 = vperm.xlu0 %1080, %v1259_v17  }
  0x63   :  { %1053 = vset.pattern.permute.xlu1 %v1118_v34 }
  0x64   :  { %303 = vperm.xlu1 %1053, %v1230_v12   ;;  %403 = vperm.xlu0 %1080, %v1230_v12  }
  0x68   :  { %1054 = vset.pattern.permute.xlu1 %v1742_v37  ;;  %391 = vperm.xlu0 %1080, %v1223_v11  }
  0x69   :  { %407 = vperm.xlu1 %1054, %v1247_v15  }
  0x6c   :  { %379 = vperm.xlu0 %1080, %v1194_v6  }
  0x6d   :  { %1055 = vset.pattern.permute.xlu1 %v1744_v33 }
  0x6e   :  { %615 = vperm.xlu1 %1055, %v1259_v17  }
  0x70   :  { %367 = vperm.xlu0 %1080, %v1168_v1  }
  0x72   :  { %1056 = vset.pattern.permute.xlu1 %v1118_v34 }
  0x73   :  { %299 = vperm.xlu1 %1056, %v1235_v13  }
  0x74   :  { %1083 = vset.pattern.permute.xlu0 %v1118_v34 }
  0x75   :  { %319 = vperm.xlu0 %1083, %v1254_v16  }
  0x77   :  { %1057 = vset.pattern.permute.xlu1 %v1746_v36 }
  0x78   :  { %507 = vperm.xlu1 %1057, %v1247_v15  }
  0x79   :  { %307 = vperm.xlu0 %1083, %v1247_v15  }
  0x7c   :  { %1058 = vset.pattern.permute.xlu1 %v1744_v33 }
  0x7d   :  { %611 = vperm.xlu1 %1058, %v1242_v14   ;;  %295 = vperm.xlu0 %1083, %v1218_v10  }
  0x80   :  { %v75_v43 = vpop.permute.xlu1 %74  ;;  %v65_v44 = vpop.permute.xlu0 %64 }
  0x81   :  { %v146_v45 = vmul.f32 %v1364_v42, %v65_v44  ;;  %1059 = vset.pattern.permute.xlu1 %v1742_v37  ;;  %283 = vperm.xlu0 %1083, %v1211_v9   ;;  %v148_v15 = vmul.f32 %v1364_v42, %v75_v43 }
  0x82   :  { %399 = vperm.xlu1 %1059, %v1235_v13  }
  0x84   :  { %v1370_v46 = vpop.permute.xlu1 %79  ;;  %v70_v47 = vpop.permute.xlu0 %69 }
  0x85   :  { %v1373_v48 = vmul.f32 %v1364_v42, %v70_v47  ;;  %271 = vperm.xlu0 %1083, %v1182_v4  }
  0x86   :  { %1060 = vset.pattern.permute.xlu1 %v1746_v36 }
  0x87   :  { %1750 = vst [vmem:[#allocation7_spill] sm:$0xff] %v1373_v48  ;;  %503 = vperm.xlu1 %1060, %v1230_v12  }
  0x88   :  { %v1378_v49 = vpop.permute.xlu1 %89  ;;  %v85_v50 = vpop.permute.xlu0 %84 }
  0x89   :  { %v150_v51 = vmul.f32 %v1364_v42, %v85_v50  ;;  %259 = vperm.xlu0 %1083, %v1173_v2  }
  0x8b   :  { %1062 = vset.pattern.permute.xlu1 %v1118_v34 }
  0x8c   :  { %291 = vperm.xlu1 %1062, %v1223_v11   ;;  %v1384_v52 = vpop.permute.xlu1 %99  ;;  %v95_v53 = vpop.permute.xlu0 %94 }
  0x8d   :  { %v152_v54 = vmul.f32 %v1364_v42, %v95_v53  ;;  %1086 = vset.pattern.permute.xlu0 %v1744_v33 }
  0x8e   :  { %595 = vperm.xlu0 %1086, %v1218_v10  }
  0x90   :  { %1063 = vset.pattern.permute.xlu1 %v1742_v37  ;;  %v1390_v55 = vpop.permute.xlu1 %109  ;;  %v105_v56 = vpop.permute.xlu0 %104 }
  0x91   :  { %v154_v57 = vmul.f32 %v1364_v42, %v105_v56  ;;  %395 = vperm.xlu1 %1063, %v1218_v10  }
  0x92   :  { %583 = vperm.xlu0 %1086, %v1211_v9  }
  0x94   :  { %v1395_v58 = vpop.permute.xlu1 %119  ;;  %v115_v59 = vpop.permute.xlu0 %114 }
  0x95   :  { %1064 = vset.pattern.permute.xlu1 %v1744_v33  ;;  %v156_v25 = vmul.f32 %v1364_v42, %v115_v59 }
  0x96   :  { %603 = vperm.xlu1 %1064, %v1230_v12   ;;  %571 = vperm.xlu0 %1086, %v1182_v4  }
  0x98   :  { %v1400_v60 = vpop.permute.xlu1 %129  ;;  %v1402_v61 = vpop.permute.xlu0 %124 }
  0x9a   :  { %1065 = vset.pattern.permute.xlu1 %v1118_v34  ;;  %567 = vperm.xlu0 %1086, %v1168_v1  }
  0x9b   :  { %287 = vperm.xlu1 %1065, %v1206_v8  }
  0x9c   :  { %v1407_v62 = vpop.permute.xlu1 %139  ;;  %v1409_v63 = vpop.permute.xlu0 %134 }
  0x9d   :  { %v160_v40 = vmul.f32 %v1364_v42, %v1409_v63  ;;  %v158_v63 = vmul.f32 %v1364_v42, %v1402_v61 }
  0x9e   :  { %563 = vperm.xlu0 %1086, %v1187_v5  }
  0x9f   :  { %1066 = vset.pattern.permute.xlu1 %v1746_v36 }
  0xa0   :  { %495 = vperm.xlu1 %1066, %v1218_v10   ;;  %v1414_v0 = vpop.permute.xlu1 %169  ;;  %v165_v12 = vpop.permute.xlu0 %164 }
  0xa1   :  { %1751 = vst [vmem:[#allocation8_spill] sm:$0xff] %v1414_v0  ;;  %v1416_v14 = vadd.f32 %v165_v12, %v146_v45  ;;  %v1756_v0 = vmov 3  }
  0xa2   :  { %1092 = vset.pattern.permute.xlu0 %v1741_v3  ;;  %v524_v3 = vsub.s32 3, %v1348_v39 }
  0xa4   :  { %1067 = vset.pattern.permute.xlu1 %v1744_v33  ;;  %v1421_v16 = vpop.permute.xlu1 %179  ;;  %v175_v17 = vpop.permute.xlu0 %174 }
  0xa5   :  { %v1423_v18 = vadd.f32 %v175_v17, %v148_v15  ;;  %599 = vperm.xlu1 %1067, %v1235_v13   ;;  %v324_v17 = vsub.s32 1, %v1348_v39 }
  0xa7   :  { %1752 = vst [vmem:[#allocation9_spill] sm:$0xff] %v1423_v18 }
  0xa8   :  { %v1426_v19 = vpop.permute.xlu1 %189  ;;  %v185_v10 = vpop.permute.xlu0 %184 }
  0xa9   :  { %1068 = vset.pattern.permute.xlu1 %v1742_v37  ;;  %v1429_v20 = vadd.f32 %v185_v10, %v150_v51 }
  0xaa   :  { %387 = vperm.xlu1 %1068, %v1206_v8  }
  0xab   :  { %1753 = vst [vmem:[#allocation10_spill] sm:$0xff] %v1429_v20 }
  0xac   :  { %v1432_v21 = vpop.permute.xlu1 %199  ;;  %v195_v22 = vpop.permute.xlu0 %194 }
  0xad   :  { %v1434_v23 = vadd.f32 %v195_v22, %v152_v54 }
  0xae   :  { %1069 = vset.pattern.permute.xlu1 %v1746_v36 }
  0xaf   :  { %491 = vperm.xlu1 %1069, %v1223_v11  }
  0xb0   :  { %v1438_v24 = vpop.permute.xlu1 %209  ;;  %v205_v13 = vpop.permute.xlu0 %204 }
  0xb1   :  { %v1441_v26 = vadd.f32 %v205_v13, %v154_v57  ;;  %v1495_v13 = vrot.slane %v1357_v41, %v324_v17 }
  0xb3   :  { %1070 = vset.pattern.permute.xlu1 %v1118_v34 }
  0xb4   :  { %279 = vperm.xlu1 %1070, %v1194_v6   ;;  %v1445_v27 = vpop.permute.xlu1 %219  ;;  %v215_v28 = vpop.permute.xlu0 %214 }
  0xb5   :  { %v1447_v29 = vadd.f32 %v215_v28, %v156_v25  ;;  %v424_v25 = vsub.s32 2, %v1348_v39 }
  0xb7   :  { %v1508_v17 = vrot.slane %v1357_v41, %v424_v25 }
  0xb8   :  { %1071 = vset.pattern.permute.xlu1 %v1742_v37  ;;  %v1450_v30 = vpop.permute.xlu1 %239  ;;  %v1452_v31 = vpop.permute.xlu0 %224 }
  0xb9   :  { %383 = vperm.xlu1 %1071, %v1211_v9  }
  0xbc   :  { %v235_v32 = vpop.permute.xlu1 %234 }
  0xbd   :  { %1072 = vset.pattern.permute.xlu1 %v1744_v33  ;;  %v1456_v35 = vpop.permute.xlu0 %619  ;;  %v256_v48 = vadd.f32 %v235_v32, %v160_v40 }
  0xbe   :  { %591 = vperm.xlu1 %1072, %v1223_v11  }
  0xc1   :  { %v316_v38 = vpop.permute.xlu1 %315  ;;  %v1459_v43 = vpop.permute.xlu0 %607 }
  0xc2   :  { %1073 = vset.pattern.permute.xlu1 %v1118_v34 }
  0xc3   :  { %275 = vperm.xlu1 %1073, %v1199_v7  }
  0xc6   :  { %v230_v44 = vpop.permute.xlu1 %229  ;;  %v1463_v45 = vpop.permute.xlu0 %511 }
  0xc7   :  { %1074 = vset.pattern.permute.xlu1 %v1746_v36 }
  0xc8   :  { %483 = vperm.xlu1 %1074, %v1211_v9  }
  0xca   :  { %v1467_v47 = vpop.permute.xlu0 %499 }
  0xcb   :  { %v312_v50 = vpop.permute.xlu1 %311 }
  0xcc   :  { %1075 = vset.pattern.permute.xlu1 %v1744_v33 }
  0xcd   :  { %587 = vperm.xlu1 %1075, %v1206_v8  }
  0xce   :  { %v1471_v11 = vpop.permute.xlu0 %487 }
  0xd0   :  { %v520_v51 = vpop.permute.xlu1 %519 }
  0xd1   :  { %1076 = vset.pattern.permute.xlu1 %v1742_v37 }
  0xd2   :  { %375 = vperm.xlu1 %1076, %v1199_v7   ;;  %v1475_v53 = vpop.permute.xlu0 %475 }
  0xd3   :  { %1754 = vst [vmem:[#allocation11_spill] sm:$0xff] %v1475_v53 }
  0xd5   :  { %v412_v54 = vpop.permute.xlu1 %411 }
  0xd6   :  { %1077 = vset.pattern.permute.xlu1 %v1746_v36  ;;  %v161_v36 = vmul.f32 %v1364_v42, %v1407_v62  ;;  %v439_v32 = vmul.f32 %v1508_v17, %v412_v54 }
  0xd7   :  { %479 = vperm.xlu1 %1077, %v1194_v6   ;;  %v420_v9 = vpop.permute.xlu0 %419 }
  0xd8   :  { %v257_v18 = vadd.f32 %v1450_v30, %v161_v36  ;;  %v441_v62 = vmul.f32 %v1508_v17, %v420_v9  ;;  %v1757_v30 = vmov 4  }
  0xda   :  { %v516_v56 = vpop.permute.xlu1 %515 }
  0xdb   :  { %1078 = vset.pattern.permute.xlu1 %v1118_v34  ;;  %v416_v57 = vpop.permute.xlu0 %415 }
  0xdc   :  { %267 = vperm.xlu1 %1078, %v1168_v1  }
  0xdf   :  { %v1481_v8 = vpop.permute.xlu1 %303  ;;  %v1483_v59 = vpop.permute.xlu0 %403 }
  0xe0   :  { %1079 = vset.pattern.permute.xlu1 %v1742_v37  ;;  %v340_v37 = vmul.f32 %v1495_v13, %v316_v38  ;;  %v440_v38 = vmul.f32 %v1508_v17, %v416_v57 }
  0xe1   :  { %371 = vperm.xlu1 %1079, %v1182_v4  }
  0xe2   :  { %v356_v40 = vadd.f32 %v340_v37, %v256_v48 }
  0xe3   :  { %v1487_v12 = vpop.permute.xlu0 %391 }
  0xe4   :  { %v408_v15 = vpop.permute.xlu1 %407  ;;  %v456_v36 = vadd.f32 %v440_v38, %v356_v40  ;;  %v1758_v38 = vmov 2  }
  0xe5   :  { %1081 = vset.pattern.permute.xlu1 %v1744_v33 }
  0xe6   :  { %579 = vperm.xlu1 %1081, %v1194_v6   ;;  %v624_v6 = vsub.s32 4, %v1348_v39  ;;  %v339_v39 = vmul.f32 %v1495_v13, %v312_v50 }
  0xe7   :  { %v1492_v10 = vpop.permute.xlu0 %379 }
  0xe8   :  { %v1527_v53 = vrot.slane %v1357_v41, %v624_v6 }
  0xe9   :  { %v616_v22 = vpop.permute.xlu1 %615 }
  0xea   :  { %1082 = vset.pattern.permute.xlu1 %v1118_v34  ;;  %v159_v34 = vmul.f32 %v1364_v42, %v1400_v60  ;;  %v1522_v60 = vrot.slane %v1357_v41, %v524_v3  ;;  %v641_v9 = vmul.f32 %v1527_v53, %v1456_v35 }
  0xeb   :  { %263 = vperm.xlu1 %1082, %v1187_v5   ;;  %v1500_v28 = vpop.permute.xlu0 %367 }
  0xec   :  { %1755 = vst [vmem:[#allocation12_spill] sm:$0xff] %v1500_v28  ;;  %v255_v61 = vadd.f32 %v230_v44, %v159_v34  ;;  %v539_v48 = vmul.f32 %v1522_v60, %v1463_v45  ;;  %v438_v44 = vmul.f32 %v1508_v17, %v408_v15  ;;  %v638_v45 = vmul.f32 %v1527_v53, %v1459_v43 }
  0xee   :  { %v300_v33 = vpop.permute.xlu1 %299  ;;  %v355_v20 = vadd.f32 %v339_v39, %v255_v61  ;;  %v540_v39 = vmul.f32 %v1522_v60, %v516_v56 }
  0xef   :  { %1084 = vset.pattern.permute.xlu1 %v1756_v0  ;;  %v336_v15 = vmul.f32 %v1495_v13, %v300_v33 }
  0xf0   :  { %471 = vperm.xlu1 %1084, %v1182_v4   ;;  %v320_v25 = vpop.permute.xlu0 %319  ;;  %v254_v4 = vadd.f32 %v1452_v31, %v158_v63  ;;  %v640_v31 = vmul.f32 %v1527_v53, %v616_v22  ;;  %v556_v35 = vadd.f32 %v540_v39, %v456_v36 }
  0xf1   :  { %v341_v28 = vmul.f32 %v1495_v13, %v320_v25  ;;  %v541_v25 = vmul.f32 %v1522_v60, %v520_v51  ;;  %v352_v43 = vadd.f32 %v336_v15, %v1447_v29 }
  0xf2   :  { %v656_v56 = vadd.f32 %v640_v31, %v556_v35 }
  0xf3   :  { %v357_v50 = vadd.f32 %v341_v28, %v257_v18  ;;  %v508_v57 = vpop.permute.xlu1 %507  ;;  %v455_v18 = vadd.f32 %v439_v32, %v355_v20 }
  0xf4   :  { %1085 = vset.pattern.permute.xlu1 %v1757_v30  ;;  %v308_v3 = vpop.permute.xlu0 %307  ;;  %v538_v34 = vmul.f32 %v1522_v60, %v508_v57 }
  0xf5   :  { %v457_v41 = vadd.f32 %v441_v62, %v357_v50  ;;  %v338_v37 = vmul.f32 %v1495_v13, %v308_v3  ;;  %575 = vperm.xlu1 %1085, %v1199_v7   ;;  %v555_v22 = vadd.f32 %v539_v48, %v455_v18  ;;  %v536_v50 = vmul.f32 %v1522_v60, %v1467_v47 }
  0xf6   :  { %v149_v3 = vmul.f32 %v1364_v42, %v1370_v46 }
  0xf7   :  { %v557_v54 = vadd.f32 %v541_v25, %v457_v41  ;;  %v354_v28 = vadd.f32 %v338_v37, %v254_v4  ;;  %v672_v4 = vmax.f32 %v656_v56, 0.0  ;;  %v155_v56 = vmul.f32 %v1364_v42, %v1390_v55  ;;  %v683_v55 = vld [vmem:[%s1736_s4 + $0x8] sm:$0xff] }
  0xf8   :  { %v612_v6 = vpop.permute.xlu1 %611  ;;  %v1542_v51 = vpop.permute.xlu0 %295  ;;  %v245_v41 = vadd.f32 %v1421_v16, %v149_v3 }
  0xf9   :  { %v454_v63 = vadd.f32 %v438_v44, %v354_v28  ;;  %v639_v7 = vmul.f32 %v1527_v53, %v612_v6  ;;  %1087 = vset.pattern.permute.xlu1 %v1758_v38  ;;  %v657_v20 = vadd.f32 %v641_v9, %v557_v54  ;;  %v157_v44 = vmul.f32 %v1364_v42, %v1395_v58 }
  0xfa   :  { %363 = vperm.xlu1 %1087, %v1187_v5   ;;  %v337_v54 = vmul.f32 %v1495_v13, %v1481_v8  ;;  %v434_v28 = vmul.f32 %v1508_v17, %v1487_v12  ;;  %v437_v58 = vmul.f32 %v1508_v17, %v1483_v59  ;;  %v674_v59 = vld [vmem:[%s1735_s3] sm:$0xff]  ;;  %v335_v15 = vmul.f32 %v1495_v13, %v1542_v51 }
  0xfb   :  { %v554_v62 = vadd.f32 %v538_v34, %v454_v63  ;;  %v673_v40 = vmax.f32 %v657_v20, 0.0  ;;  %v655_v61 = vadd.f32 %v639_v7, %v555_v22  ;;  %v253_v6 = vadd.f32 %v1445_v27, %v157_v44  ;;  %994 = vmatprep.mubr.f32.mxu0 %v674_v59 }
  0xfc   :  { %v1551_v32 = vpop.permute.xlu0 %283  ;;  %v1759_v22 = vmov 0  }
  0xfd   :  { %v400_v57 = vpop.permute.xlu1 %399  ;;  %962 = vmatprep.subr.mxu0 %v673_v40  ;;  %1006 = vmatprep.subr.mxu1 %v673_v40  ;;  %v654_v33 = vadd.f32 %v638_v45, %v554_v62  ;;  %v671_v9 = vmax.f32 %v655_v61, 0.0  ;;  %v678_v45 = vld [vmem:[%s1735_s3 + $0x20] sm:$0xff] }
  0xfe   :  { %v436_v36 = vmul.f32 %v1508_v17, %v400_v57  ;;  %1088 = vset.pattern.permute.xlu1 %v1756_v0  ;;  %963 = vmatpush3.msra.mxu0 %v673_v40  ;;  %v684_v57 = vld [vmem:[%s1736_s4 + $0x10] sm:$0xff] }
  0xff   :  { %1022 = vmatpush3.msra.mxu1 %v673_v40  ;;  %467 = vperm.xlu1 %1088, %v1168_v1   ;;  %v670_v48 = vmax.f32 %v654_v33, 0.0 }
 0x100   :  { %v452_v47 = vadd.f32 %v436_v36, %v352_v43  ;;  %964 = vmatprep.subr.mxu0 %v672_v4  ;;  %1007 = vmatprep.subr.mxu1 %v672_v4  ;;  %v272_v25 = vpop.permute.xlu0 %271 }
 0x101   :  { %v329_v29 = vmul.f32 %v1495_v13, %v272_v25  ;;  %965 = vmatpush3.msra.mxu0 %v672_v4  ;;  %1023 = vmatpush3.msra.mxu1 %v672_v4  ;;  %v685_v4 = vld [vmem:[%s1736_s4 + $0x18] sm:$0xff] }
 0x102   :  { %966 = vmatprep.subr.mxu0 %v671_v9  ;;  %1008 = vmatprep.subr.mxu1 %v671_v9  ;;  %v504_v37 = vpop.permute.xlu1 %503  ;;  %v1563_v18 = vadd.f32 %v536_v50, %v452_v47  ;;  %v153_v47 = vmul.f32 %v1364_v42, %v1384_v52 }
 0x103   :  { %v1565_v46 = vadd.f32 %v329_v29, %v245_v41  ;;  %967 = vmatpush3.msra.mxu0 %v671_v9  ;;  %1024 = vmatpush3.msra.mxu1 %v671_v9  ;;  %v537_v8 = vmul.f32 %v1522_v60, %v504_v37  ;;  %v843_v9 = vld [vmem:[%s1737_s5] sm:$0xff]  ;;  %v844_v41 = vld [vmem:[%s1737_s5 + $0x8] sm:$0xff] }
 0x104   :  { %1089 = vset.pattern.permute.xlu1 %v1758_v38  ;;  %968 = vmatprep.subr.mxu0 %v670_v48  ;;  %v260_v1 = vpop.permute.xlu0 %259 }
 0x105   :  { %1009 = vmatprep.subr.mxu1 %v670_v48  ;;  %359 = vperm.xlu1 %1089, %v1173_v2   ;;  %v326_v16 = vmul.f32 %v1495_v13, %v260_v1 }
 0x106   :  { %969 = vmatpush3.msra.mxu0 %v670_v48  ;;  %1025 = vmatpush3.msra.mxu1 %v670_v48  ;;  %v249_v48 = vadd.f32 %v1432_v21, %v153_v47  ;;  %v686_v21 = vld [vmem:[%s1736_s4 + $0x20] sm:$0xff] }
 0x107   :  { %v1571_v39 = vadd.f32 %v326_v16, %v1416_v14  ;;  %v292_v31 = vpop.permute.xlu1 %291  ;;  %v353_v14 = vadd.f32 %v337_v54, %v253_v6  ;;  %1000 = vmatprep.mubr.f32.mxu1 %v678_v45  ;;  %v687_v6 = vld [vmem:[%s1736_s4 + $0x28] sm:$0xff] }
 0x108   :  { %v334_v35 = vmul.f32 %v1495_v13, %v292_v31  ;;  %v533_v31 = vmul.f32 %v1522_v60, %v1471_v11  ;;  %v1760_v47 = vld [vmem:[#allocation10_spill] sm:$0xff] }
 0x109   :  { %1090 = vset.pattern.permute.xlu1 %v1756_v0  ;;  %v453_v12 = vadd.f32 %v437_v58, %v353_v14  ;;  %v596_v61 = vpop.permute.xlu0 %595  ;;  %v151_v14 = vmul.f32 %v1364_v42, %v1378_v49 }
 0x10a   :  { %v350_v34 = vadd.f32 %v334_v35, %v1441_v26  ;;  %463 = vperm.xlu1 %1090, %v1187_v5   ;;  %v635_v36 = vmul.f32 %v1527_v53, %v596_v61 }
 0x10b   :  { %v553_v0 = vadd.f32 %v537_v8, %v453_v12  ;;  %v431_v8 = vmul.f32 %v1508_v17, %v1492_v10  ;;  %v848_v10 = vld [vmem:[%s1737_s5 + $0x28] sm:$0xff] }
 0x10c   :  { %v396_v63 = vpop.permute.xlu1 %395  ;;  %v1586_v7 = vadd.f32 %v434_v28, %v350_v34  ;;  %v846_v34 = vld [vmem:[%s1737_s5 + $0x18] sm:$0xff] }
 0x10d   :  { %v584_v61 = vpop.permute.xlu0 %583 }
 0x10e   :  { %459 = vperm.xlu1 %1090, %v1173_v2  }
 0x111   :  { %v604_v38 = vpop.permute.xlu1 %603 }
 0x112   :  { %v637_v27 = vmul.f32 %v1527_v53, %v604_v38  ;;  %1091 = vset.pattern.permute.xlu1 %v1757_v30  ;;  %v435_v30 = vmul.f32 %v1508_v17, %v396_v63  ;;  %v247_v63 = vadd.f32 %v1426_v19, %v151_v14  ;;  %v688_v38 = vld [vmem:[%s1736_s4 + $0x30] sm:$0xff]  ;;  %v689_v19 = vld [vmem:[%s1736_s4 + $0x38] sm:$0xff] }
 0x113   :  { %559 = vperm.xlu1 %1091, %v1173_v2   ;;  %v251_v2 = vadd.f32 %v1438_v24, %v155_v56  ;;  %v682_v24 = vld [vmem:[%s1736_s4] sm:$0xff] }
 0x114   :  { %v653_v5 = vadd.f32 %v637_v27, %v553_v0  ;;  %692 = vperm.xlu0 %1092, %v682_v24   ;;  %v847_v0 = vld [vmem:[%s1737_s5 + $0x20] sm:$0xff] }
 0x115   :  { %v351_v62 = vadd.f32 %v335_v15, %v251_v2  ;;  %v912_v2 = vld [vmem:[#allocation2] sm:$0x1] }
 0x116   :  { %v669_v26 = vmax.f32 %v653_v5, 0.0  ;;  %v288_v20 = vpop.permute.xlu1 %287 }
 0x117   :  { %1093 = vset.pattern.permute.xlu1 %v1759_v22  ;;  %v451_v50 = vadd.f32 %v435_v30, %v351_v62  ;;  %v333_v25 = vmul.f32 %v1495_v13, %v288_v20  ;;  %v850_v20 = vld [vmem:[%s1737_s5 + $0x38] sm:$0xff]  ;;  %v332_v62 = vmul.f32 %v1495_v13, %v1551_v32 }
 0x118   :  { %970 = vmatprep.subr.mxu0 %v669_v26  ;;  %1010 = vmatprep.subr.mxu1 %v669_v26 }
 0x119   :  { %971 = vmatpush3.msra.mxu0 %v669_v26  ;;  %1026 = vmatpush3.msra.mxu1 %v669_v26  ;;  %v349_v44 = vadd.f32 %v333_v25, %v249_v48  ;;  %v849_v26 = vld [vmem:[%s1737_s5 + $0x30] sm:$0xff] }
 0x11a   :  { %697 = vperm.xlu1 %1093, %v683_v55   ;;  %707 = vperm.xlu0 %1092, %v685_v4  }
 0x11b   :  { %v496_v40 = vpop.permute.xlu1 %495 }
 0x11c   :  { %v535_v51 = vmul.f32 %v1522_v60, %v496_v40 }
 0x11e   :  { %v551_v43 = vadd.f32 %v535_v51, %v451_v50  ;;  %702 = vperm.xlu1 %1093, %v684_v57   ;;  %858 = vperm.xlu0 %1092, %v844_v41   ;;  %v632_v57 = vmul.f32 %v1527_v53, %v584_v61  ;;  %v1765_v61 = vld [vmem:[#allocation8_spill] sm:$0xff] }
 0x120   :  { %v600_v33 = vpop.permute.xlu1 %599  ;;  %v651_v29 = vadd.f32 %v635_v36, %v551_v43 }
 0x121   :  { %v636_v3 = vmul.f32 %v1527_v53, %v600_v33 }
 0x122   :  { %853 = vperm.xlu1 %1093, %v843_v9   ;;  %v667_v54 = vmax.f32 %v651_v29, 0.0  ;;  %v1761_v29 = vld [vmem:[#allocation11_spill] sm:$0xff] }
 0x123   :  { %v652_v37 = vadd.f32 %v636_v3, %v1563_v18  ;;  %v845_v18 = vld [vmem:[%s1737_s5 + $0x10] sm:$0xff] }
 0x124   :  { %863 = vperm.xlu0 %1092, %v845_v18  }
 0x125   :  { %v668_v1 = vmax.f32 %v652_v37, 0.0  ;;  %v388_v16 = vpop.permute.xlu1 %387  ;;  %v530_v37 = vmul.f32 %v1522_v60, %v1761_v29 }
 0x126   :  { %v433_v52 = vmul.f32 %v1508_v17, %v388_v16  ;;  %712 = vperm.xlu1 %1093, %v686_v21  }
 0x127   :  { %972 = vmatprep.subr.mxu0 %v668_v1  ;;  %1011 = vmatprep.subr.mxu1 %v668_v1 }
 0x128   :  { %v449_v28 = vadd.f32 %v433_v52, %v349_v44  ;;  %973 = vmatpush3.msra.mxu0 %v668_v1  ;;  %1027 = vmatpush3.msra.mxu1 %v668_v1  ;;  %v1762_v52 = vld [vmem:[#allocation12_spill] sm:$0xff] }
 0x129   :  { %974 = vmatprep.subr.mxu0 %v667_v54  ;;  %1012 = vmatprep.subr.mxu1 %v667_v54 }
 0x12a   :  { %v492_v11 = vpop.permute.xlu1 %491  ;;  %975 = vmatpush3.msra.mxu0 %v667_v54  ;;  %1028 = vmatpush3.msra.mxu1 %v667_v54  ;;  %v549_v35 = vadd.f32 %v533_v31, %v449_v28  ;;  %v428_v54 = vmul.f32 %v1508_v17, %v1762_v52  ;;  %v1763_v28 = vld [vmem:[#allocation9_spill] sm:$0xff] }
 0x12b   :  { %717 = vperm.xlu1 %1093, %v687_v6   ;;  %868 = vperm.xlu0 %1092, %v846_v34   ;;  %v534_v5 = vmul.f32 %v1522_v60, %v492_v11 }
 0x12d   :  { %v550_v45 = vadd.f32 %v534_v5, %v1586_v7  ;;  %v348_v7 = vadd.f32 %v332_v62, %v1434_v23 }
 0x12f   :  { %v280_v58 = vpop.permute.xlu1 %279  ;;  %722 = vperm.xlu1 %1093, %v688_v38   ;;  %873 = vperm.xlu0 %1092, %v847_v0  }
 0x130   :  { %v331_v12 = vmul.f32 %v1495_v13, %v280_v58 }
 0x132   :  { %v347_v27 = vadd.f32 %v331_v12, %v247_v63 }
 0x133   :  { %727 = vperm.xlu1 %1093, %v689_v19   ;;  %878 = vperm.xlu0 %1092, %v848_v10  }
 0x134   :  { %v384_v42 = vpop.permute.xlu1 %383  ;;  %v447_v49 = vadd.f32 %v431_v8, %v347_v27  ;;  %v572_v27 = vpop.permute.xlu0 %571 }
 0x135   :  { %v432_v40 = vmul.f32 %v1508_v17, %v384_v42 }
 0x137   :  { %883 = vperm.xlu1 %1093, %v849_v26   ;;  %888 = vperm.xlu0 %1092, %v850_v20   ;;  %v448_v24 = vadd.f32 %v432_v40, %v348_v7 }
 0x139   :  { %v592_v59 = vpop.permute.xlu1 %591 }
 0x13a   :  { %v634_v56 = vmul.f32 %v1527_v53, %v592_v59 }
 0x13b   :  { %915 = vperm.xlu1 %1093, %v912_v2  }
 0x13c   :  { %v650_v15 = vadd.f32 %v634_v56, %v550_v45 }
 0x13e   :  { %v666_v30 = vmax.f32 %v650_v15, 0.0  ;;  %v276_v22 = vpop.permute.xlu1 %275  ;;  %v568_v15 = vpop.permute.xlu0 %567 }
 0x13f   :  { %v330_v43 = vmul.f32 %v1495_v13, %v276_v22 }
 0x140   :  { %976 = vmatprep.subr.mxu0 %v666_v30  ;;  %1013 = vmatprep.subr.mxu1 %v666_v30 }
 0x141   :  { %977 = vmatpush3.msra.mxu0 %v666_v30  ;;  %1029 = vmatpush3.msra.mxu1 %v666_v30  ;;  %v346_v25 = vadd.f32 %v330_v43, %v1760_v47 }
 0x143   :  { %v484_v55 = vpop.permute.xlu1 %483 }
 0x144   :  { %v532_v51 = vmul.f32 %v1522_v60, %v484_v55 }
 0x146   :  { %v548_v50 = vadd.f32 %v532_v51, %v448_v24  ;;  %v1764_v51 = vld [vmem:[#allocation7_spill] sm:$0xff] }
 0x147   :  { %v243_v24 = vadd.f32 %v1765_v61, %v1764_v51 }
 0x148   :  { %v588_v4 = vpop.permute.xlu1 %587  ;;  %v648_v36 = vadd.f32 %v632_v57, %v548_v50 }
 0x149   :  { %v633_v32 = vmul.f32 %v1527_v53, %v588_v4  ;;  %v564_v4 = vpop.permute.xlu0 %563 }
 0x14a   :  { %v664_v41 = vmax.f32 %v648_v36, 0.0 }
 0x14b   :  { %v649_v33 = vadd.f32 %v633_v32, %v549_v35 }
 0x14d   :  { %v665_v3 = vmax.f32 %v649_v33, 0.0  ;;  %v376_v9 = vpop.permute.xlu1 %375  ;;  %v627_v33 = vmul.f32 %v1527_v53, %v564_v4 }
 0x14e   :  { %v430_v23 = vmul.f32 %v1508_v17, %v376_v9 }
 0x14f   :  { %978 = vmatprep.subr.mxu0 %v665_v3  ;;  %1014 = vmatprep.subr.mxu1 %v665_v3 }
 0x150   :  { %v446_v48 = vadd.f32 %v430_v23, %v346_v25  ;;  %979 = vmatpush3.msra.mxu0 %v665_v3  ;;  %1030 = vmatpush3.msra.mxu1 %v665_v3 }
 0x151   :  { %980 = vmatprep.subr.mxu0 %v664_v41  ;;  %1015 = vmatprep.subr.mxu1 %v664_v41 }
 0x152   :  { %v480_v1 = vpop.permute.xlu1 %479  ;;  %981 = vmatpush3.msra.mxu0 %v664_v41  ;;  %1031 = vmatpush3.msra.mxu1 %v664_v41  ;;  %v546_v16 = vadd.f32 %v530_v37, %v446_v48 }
 0x153   :  { %v531_v35 = vmul.f32 %v1522_v60, %v480_v1 }
 0x155   :  { %v547_v34 = vadd.f32 %v531_v35, %v447_v49  ;;  %v629_v49 = vmul.f32 %v1527_v53, %v572_v27 }
 0x157   :  { %v268_v31 = vpop.permute.xlu1 %267 }
 0x158   :  { %v328_v44 = vmul.f32 %v1495_v13, %v268_v31  ;;  %v677_v31 = vld [vmem:[%s1735_s3 + $0x18] sm:$0xff] }
 0x15a   :  { %v344_v21 = vadd.f32 %v328_v44, %v1763_v28  ;;  %v681_v44 = vld [vmem:[%s1735_s3 + $0x38] sm:$0xff] }
 0x15c   :  { %v372_v18 = vpop.permute.xlu1 %371  ;;  %v444_v11 = vadd.f32 %v428_v54, %v344_v21 }
 0x15d   :  { %v429_v12 = vmul.f32 %v1508_v17, %v372_v18 }
 0x15f   :  { %v445_v42 = vadd.f32 %v429_v12, %v1565_v46  ;;  %v628_v46 = vmul.f32 %v1527_v53, %v568_v15 }
 0x161   :  { %v580_v6 = vpop.permute.xlu1 %579 }
 0x162   :  { %v631_v14 = vmul.f32 %v1527_v53, %v580_v6 }
 0x164   :  { %v647_v58 = vadd.f32 %v631_v14, %v547_v34 }
 0x166   :  { %v663_v63 = vmax.f32 %v647_v58, 0.0  ;;  %v264_v8 = vpop.permute.xlu1 %263 }
 0x167   :  { %v327_v40 = vmul.f32 %v1495_v13, %v264_v8 }
 0x168   :  { %982 = vmatprep.subr.mxu0 %v663_v63  ;;  %1016 = vmatprep.subr.mxu1 %v663_v63 }
 0x169   :  { %983 = vmatpush3.msra.mxu0 %v663_v63  ;;  %1032 = vmatpush3.msra.mxu1 %v663_v63  ;;  %v343_v57 = vadd.f32 %v327_v40, %v243_v24 }
 0x16b   :  { %v472_v38 = vpop.permute.xlu1 %471 }
 0x16c   :  { %v529_v0 = vmul.f32 %v1522_v60, %v472_v38 }
 0x16e   :  { %v545_v19 = vadd.f32 %v529_v0, %v445_v42 }
 0x170   :  { %v576_v10 = vpop.permute.xlu1 %575  ;;  %v645_v26 = vadd.f32 %v629_v49, %v545_v19 }
 0x171   :  { %v630_v5 = vmul.f32 %v1527_v53, %v576_v10 }
 0x172   :  { %v661_v56 = vmax.f32 %v645_v26, 0.0 }
 0x173   :  { %v646_v20 = vadd.f32 %v630_v5, %v546_v16 }
 0x175   :  { %v662_v59 = vmax.f32 %v646_v20, 0.0  ;;  %v364_v45 = vpop.permute.xlu1 %363 }
 0x176   :  { %v427_v50 = vmul.f32 %v1508_v17, %v364_v45 }
 0x177   :  { %984 = vmatprep.subr.mxu0 %v662_v59  ;;  %1017 = vmatprep.subr.mxu1 %v662_v59 }
 0x178   :  { %985 = vmatpush3.msra.mxu0 %v662_v59  ;;  %1033 = vmatpush3.msra.mxu1 %v662_v59  ;;  %v443_v43 = vadd.f32 %v427_v50, %v343_v57 }
 0x179   :  { %986 = vmatprep.subr.mxu0 %v661_v56  ;;  %1018 = vmatprep.subr.mxu1 %v661_v56 }
 0x17a   :  { %v468_v2 = vpop.permute.xlu1 %467  ;;  %987 = vmatpush3.msra.mxu0 %v661_v56  ;;  %1034 = vmatpush3.msra.mxu1 %v661_v56 }
 0x17b   :  { %v528_v30 = vmul.f32 %v1522_v60, %v468_v2 }
 0x17d   :  { %v544_v22 = vadd.f32 %v528_v30, %v444_v11 }
 0x17f   :  { %v644_v62 = vadd.f32 %v628_v46, %v544_v22 }
 0x180   :  { %v360_v7 = vpop.permute.xlu1 %359 }
 0x181   :  { %v660_v55 = vmax.f32 %v644_v62, 0.0  ;;  %v426_v3 = vmul.f32 %v1508_v17, %v360_v7  ;;  %v675_v17 = vld [vmem:[%s1735_s3 + $0x8] sm:$0xff] }
 0x183   :  { %988 = vmatprep.subr.mxu0 %v660_v55  ;;  %1019 = vmatprep.subr.mxu1 %v660_v55  ;;  %v442_v41 = vadd.f32 %v426_v3, %v1571_v39  ;;  %v676_v39 = vld [vmem:[%s1735_s3 + $0x10] sm:$0xff] }
 0x184   :  { %989 = vmatpush3.msra.mxu0 %v660_v55  ;;  %1035 = vmatpush3.msra.mxu1 %v660_v55 }
 0x185   :  { %v464_v32 = vpop.permute.xlu1 %463 }
 0x186   :  { %v527_v36 = vmul.f32 %v1522_v60, %v464_v32 }
 0x188   :  { %v543_v13 = vadd.f32 %v527_v36, %v443_v43 }
 0x189   :  { %v460_v9 = vpop.permute.xlu1 %459 }
 0x18a   :  { %v643_v47 = vadd.f32 %v627_v33, %v543_v13  ;;  %v526_v25 = vmul.f32 %v1522_v60, %v460_v9  ;;  %v679_v60 = vld [vmem:[%s1735_s3 + $0x28] sm:$0xff] }
 0x18c   :  { %v659_v23 = vmax.f32 %v643_v47, 0.0  ;;  %v542_v37 = vadd.f32 %v526_v25, %v442_v41 }
 0x18e   :  { %v560_v29 = vpop.permute.xlu1 %559  ;;  %990 = vmatprep.subr.mxu0 %v659_v23  ;;  %1020 = vmatprep.subr.mxu1 %v659_v23 }
 0x18f   :  { %v626_v48 = vmul.f32 %v1527_v53, %v560_v29  ;;  %991 = vmatpush3.msra.mxu0 %v659_v23  ;;  %1036 = vmatpush3.msra.mxu1 %v659_v23  ;;  %v680_v53 = vld [vmem:[%s1735_s3 + $0x30] sm:$0xff]  ;;  %v693_v54 = vpop.permute.xlu0 %692  ;;  %s1121_s3 = smov [#allocation3]  }
 0x190   :  { %s930_s11 = sshll.u32 %s1121_s3, 4  ;;  %s931_s11 = int_to_ptr.vmem [resolvable:$true] %s930_s11 }
 0x191   :  { %v642_v1 = vadd.f32 %v626_v48, %v542_v37  ;;  %s1094_s12 = scalar_lea.vmem %s931_s11, 16  ;;  %s1098_s13 = scalar_lea.vmem %s931_s11, 32 }
 0x192   :  { %p1095_p0 = scmp.ne.s32.totalorder %s931_s11, %s1094_s12  ;;  %p1099_p1 = scmp.lt.s32.totalorder %s931_s11, %s931_s11 }
 0x193   :  { %v658_v16 = vmax.f32 %v642_v1, 0.0  ;;  %p1100_p2 = scmp.lt.s32.totalorder %s1098_s13, %s1094_s12 }
 0x195   :  { %992 = vmatprep.subr.mxu0 %v658_v16  ;;  %1021 = vmatprep.subr.mxu1 %v658_v16  ;;  %v698_v52 = vpop.permute.xlu1 %697  ;;  %v708_v21 = vpop.permute.xlu0 %707  ;;  %p1101_p3 = por %p1100_p2, %p1099_p1 }
 0x196   :  { %993 = vmatpush3.msra.mxu0 %v658_v16  ;;  %1037 = vmatpush3.msra.mxu1 %v658_v16 }
 0x197   :  { %995 = vmatmul.mubr.f32.vlgmr.msra.gmra.mxu0 %v675_v17  ;;  %1001 = vmatmul.mubr.f32.vlgmr.msra.gmra.mxu1 %v679_v60  ;;  %p1102_p4 = pnand %p1101_p3, %p1095_p0 }
 0x198   :  { %997 = vmatprep.mubr.f32.mxu0 %v676_v39  ;;  %1003 = vmatprep.mubr.f32.mxu1 %v680_v53  ;;  %v1766_v53 = vld [vmem:[#allocation6_spill] sm:$0xff] }
 0x199   :  { %v703_v28 = vpop.permute.xlu1 %702  ;;  %v859_v11 = vpop.permute.xlu0 %858 }
 0x19b   :  { %998 = vmatmul.mubr.f32.gmra.mxu0 %v677_v31  ;;  %1004 = vmatmul.mubr.f32.gmra.mxu1 %v681_v44  ;;  %v1767_v31 = vsub.s32 0, %v1766_v53 }
 0x19d   :  { %v854_v18 = vpop.permute.xlu1 %853 }
 0x19f   :  { %v864_v6 = vpop.permute.xlu0 %863 }
 0x1a1   :  { %v713_v35 = vpop.permute.xlu1 %712 }
 0x1a6   :  { %v718_v34 = vpop.permute.xlu1 %717  ;;  %v869_v63 = vpop.permute.xlu0 %868 }
 0x1aa   :  { %v723_v10 = vpop.permute.xlu1 %722  ;;  %v874_v56 = vpop.permute.xlu0 %873 }
 0x1ae   :  { %v728_v51 = vpop.permute.xlu1 %727  ;;  %v879_v4 = vpop.permute.xlu0 %878 }
 0x1b2   :  { %v884_v9 = vpop.permute.xlu1 %883  ;;  %v889_v23 = vpop.permute.xlu0 %888 }
 0x1b6   :  { %v916_v60 = vpop.permute.xlu1 %915 }
 0x1b7   :  { %v921_v44 = vrot.slane %v916_v60, %v1767_v31 }
 0x257   :  { %v996_v14 = vpop.f32.mrf.mxu0  ;;  %v1002_v58 = vpop.f32.mrf.mxu1 }
 0x258   :  { %v802_v8 = vadd.f32 %v996_v14, %v698_v52  ;;  %v822_v46 = vadd.f32 %v1002_v58, %v718_v34 }
 0x259   :  { %v796_v12 = vpop.f32.mrf.mxu0  ;;  %v816_v38 = vpop.f32.mrf.mxu1 }
 0x25a   :  { %v797_v0 = vadd.f32 %v796_v12, %v693_v54  ;;  %v836_v19 = vmax.f32 %v802_v8, 0.0  ;;  %v817_v59 = vadd.f32 %v816_v38, %v713_v35  ;;  %v840_v61 = vmax.f32 %v822_v46, 0.0 }
 0x25b   :  { %v999_v27 = vpop.f32.mrf.mxu0  ;;  %v1005_v42 = vpop.f32.mrf.mxu1 }
 0x25c   :  { %v835_v49 = vmax.f32 %v797_v0, 0.0  ;;  %v812_v5 = vadd.f32 %v999_v27, %v708_v21  ;;  %v892_v2 = vmul.f32 %v859_v11, %v836_v19  ;;  %v839_v40 = vmax.f32 %v817_v59, 0.0 }
 0x25d   :  { %v806_v26 = vpop.f32.mrf.mxu0  ;;  %v826_v15 = vpop.f32.mrf.mxu1  ;;  %v832_v50 = vadd.f32 %v1005_v42, %v728_v51  ;;  %v896_v33 = vmul.f32 %v879_v4, %v840_v61 }
 0x25e   :  { %v891_v20 = vmul.f32 %v854_v18, %v835_v49  ;;  %v807_v45 = vadd.f32 %v806_v26, %v703_v28  ;;  %v838_v30 = vmax.f32 %v812_v5, 0.0  ;;  %v827_v55 = vadd.f32 %v826_v15, %v723_v10 }
 0x25f   :  { %v895_v32 = vmul.f32 %v874_v56, %v839_v40  ;;  %v842_v13 = vmax.f32 %v832_v50, 0.0 }
 0x260   :  { %v837_v22 = vmax.f32 %v807_v45, 0.0  ;;  %v899_v62 = vadd.f32 %v892_v2, %v891_v20  ;;  %v894_v24 = vmul.f32 %v869_v63, %v838_v30  ;;  %v841_v36 = vmax.f32 %v827_v55, 0.0 }
 0x261   :  { %v898_v41 = vmul.f32 %v889_v23, %v842_v13 }
 0x262   :  { %v893_v7 = vmul.f32 %v864_v6, %v837_v22  ;;  %v897_v47 = vmul.f32 %v884_v9, %v841_v36 }
 0x264   :  { %v900_v57 = vadd.f32 %v899_v62, %v893_v7 }
 0x266   :  { %v901_v43 = vadd.f32 %v900_v57, %v894_v24 }
 0x268   :  { %v902_v3 = vadd.f32 %v901_v43, %v895_v32 }
 0x26a   :  { %v903_v25 = vadd.f32 %v902_v3, %v896_v33 }
 0x26c   :  { %v904_v29 = vadd.f32 %v903_v25, %v897_v47 }
 0x26e   :  { %v905_v37 = vadd.f32 %v904_v29, %v898_v41 }
 0x270   :  { %v906_v48 = vrot.slane %v905_v37, 4 }
 0x272   :  { %v907_v1 = vadd.f32 %v906_v48, %v905_v37 }
 0x274   :  { %v908_v16 = vrot.slane %v907_v1, 2 }
 0x276   :  { %v909_v17 = vadd.f32 %v908_v16, %v907_v1 }
 0x278   :  { %v910_v39 = vrot.slane %v909_v17, 1 }
 0x27a   :  { %v911_v52 = vadd.f32 %v910_v39, %v909_v17 }
 0x27c   :  { %v922_v54 = vadd.f32 %v921_v44, %v911_v52 }
 0x27e   :  { %923 = vst [vmem:[#allocation3] sm:$0x1] %v922_v54 }
 0x27f   :  { %1105 = shalt.err (!%p1102_p4)
}
 0x280   :  { %933 = dma.vmem_to_hbm [thread:$0]  %s931_s11, 16, %s1739_s7, [#allocation4]  }
 0x281   :  { %1114 = dma.done.wait [#allocation4], 16  }
 0x282   :  { %1115 = vsyncadd [#allocation4], 4294967280 }
 0x283   :  { %937 = vsyncpa [#allocation4], 1 }

</bundles_post_ra>
